<compile_context>
chip_gen: v6e
topology: v6e:2x2x1
jax: 0.10.0
libtpu: 0.0.40
codegen_flags: <defaults>
</compile_context>

<pallas_src>
import jax
import jax.numpy as jnp
from jax import lax
from jax.experimental import pallas as pl
from jax.experimental.pallas import tpu as pltpu

EMBED = 32              # HP.EMBED_SIZE
EVAL_HIDDEN = 32
POS_WEIGHT_EXTRA = 2.0  # HP.POS_WEIGHT_EXTRA


# ---------------------------------------------------------------------------
# Fused kernel: all derivation steps + eval_net + loss in one program
# ---------------------------------------------------------------------------

def _fused_kernel(
    rule_ids_ref,   # SMEM [S]          int32  dense rule index per step
    scal_ref,       # SMEM [2]          f32    [eval bias2, pos_weight]
    vec_init_ref,   # VMEM [N, E]       f32    initial embeddings (zeros past axioms)
    ind_ref,        # VMEM [S, 1, m]    int32  derived-node rows per step (row layout)
    pars_ref,       # VMEM [S, 2m, 1]   int32  parent rows per step (col layout:
                    #                          first m = parent0, last m = parent1)
    wslab_ref,      # VMEM [R, 3E+2, E] f32    per-rule slab: W1(2E) | W2(E) | b1 | b2
    eslab_ref,      # VMEM [E+2, H]     f32    eval slab: ew1(E) | eb1 | ew2_row
    mask_ref,       # VMEM [M, 1]       int32  evaluated-node rows (col layout)
    pnt_ref,        # VMEM [M, 3]       f32    pos, neg, target at the mask rows
    out_ref,        # SMEM [1, 3]       f32    loss, posOK, negOK
):
    N, E = vec_init_ref.shape
    S = ind_ref.shape[0]
    m = ind_ref.shape[2]
    M = mask_ref.shape[0]

    # ---- derivation steps: one-hot gather -> rule MLP -> one-hot scatter ----
    def step_body(step, vec):
        rid = rule_ids_ref[step]
        slab = wslab_ref[rid]                                   # [3E+2, E]
        w1a = slab[0:E, :]                                      # parent-0 half of W1
        w1b = slab[E:2 * E, :]                                  # parent-1 half of W1
        w2 = slab[2 * E:3 * E, :]
        b1 = slab[3 * E:3 * E + 1, :]
        b2 = slab[3 * E + 1:3 * E + 2, :]

        pars_col = pars_ref[step]                               # [2m, 1] int32
        ind_row = ind_ref[step]                                 # [1, m]  int32

        # Gather both parents with one one-hot matmul: G[r, c] = (c == parent_r)
        lane_iota = lax.broadcasted_iota(jnp.int32, (2 * m, N), 1)
        G = (lane_iota == pars_col).astype(jnp.float32)         # [2m, N]
        X = jnp.dot(G, vec, preferred_element_type=jnp.float32)  # [2m, E]
        x0 = X[0:m, :]
        x1 = X[m:2 * m, :]

        # concat(parent0, parent1) @ W1 == x0 @ W1[:E] + x1 @ W1[E:]
        h = (jnp.dot(x0, w1a, preferred_element_type=jnp.float32)
             + jnp.dot(x1, w1b, preferred_element_type=jnp.float32) + b1)
        h = jnp.maximum(h, 0.0)
        new = jnp.dot(h, w2, preferred_element_type=jnp.float32) + b2   # [m, E]

        # Scatter: D[c, r] = (c == derived_r); derived rows within a step are distinct.
        node_iota = lax.broadcasted_iota(jnp.int32, (N, m), 0)
        D = (node_iota == ind_row).astype(jnp.float32)          # [N, m]
        scattered = jnp.dot(D, new, preferred_element_type=jnp.float32)  # [N, E]
        keep = 1.0 - jnp.sum(D, axis=1, keepdims=True)          # [N, 1]
        return vec * keep + scattered

    vec = lax.fori_loop(0, S, step_body, vec_init_ref[...])

    # ---- eval_net on the masked rows + loss / posOK / negOK ----
    mask_col = mask_ref[...]                                    # [M, 1]
    lane_iota_m = lax.broadcasted_iota(jnp.int32, (M, N), 1)
    GM = (lane_iota_m == mask_col).astype(jnp.float32)          # [M, N]
    xm = jnp.dot(GM, vec, preferred_element_type=jnp.float32)   # [M, E]

    ew1 = eslab_ref[0:E, :]
    eb1 = eslab_ref[E:E + 1, :]
    ew2r = eslab_ref[E + 1:E + 2, :]
    eb2 = scal_ref[0]
    pw = scal_ref[1]

    hh = jnp.dot(xm, ew1, preferred_element_type=jnp.float32) + eb1
    hh = jnp.maximum(hh, 0.0)
    # Output width 1: VPU multiply + lane reduction instead of a 1-wide MXU matmul.
    vals = jnp.sum(hh * ew2r, axis=-1, keepdims=True) + eb2     # [M, 1]

    pos = pnt_ref[:, 0:1]                                       # [M,3]: fine at small M
    neg = pnt_ref[:, 1:2]
    tgt = pnt_ref[:, 2:3]

    posok = jnp.sum(pos * (vals >= 0.0).astype(jnp.float32))
    negok = jnp.sum(neg * (vals < 0.0).astype(jnp.float32))

    # Stable BCE-with-logits with pos_weight:
    #   -pw*t*log(sig(v)) - (1-t)*log(1-sig(v)) = (pw*t + (1-t))*softplus(-v) + (1-t)*v
    sp_neg = jnp.maximum(-vals, 0.0) + jnp.log1p(jnp.exp(-jnp.abs(vals)))
    contrib = (pw * tgt + (1.0 - tgt)) * sp_neg + (1.0 - tgt) * vals
    loss = jnp.sum((pos + neg) * contrib)

    out_ref[0, 0] = loss
    out_ref[0, 1] = posok
    out_ref[0, 2] = negok


# ---------------------------------------------------------------------------
# LearningModel.forward equivalent (single pallas_call, no grid)
# ---------------------------------------------------------------------------

def learning_model_forward(vectors_init, rule_ids, ind_steps, pars_steps,
                           w_slab, eval_slab, scal, mask_col, pnt):
    out = pl.pallas_call(
        _fused_kernel,
        out_shape=jax.ShapeDtypeStruct((1, 3), jnp.float32),
        in_specs=[
            pl.BlockSpec(memory_space=pltpu.MemorySpace.SMEM),   # rule_ids [S]
            pl.BlockSpec(memory_space=pltpu.MemorySpace.SMEM),   # [eb2, pos_weight]
            pl.BlockSpec(memory_space=pltpu.MemorySpace.VMEM),   # vectors_init [N,E]
            pl.BlockSpec(memory_space=pltpu.MemorySpace.VMEM),   # ind_steps [S,1,m]
            pl.BlockSpec(memory_space=pltpu.MemorySpace.VMEM),   # pars_steps [S,2m,1]
            pl.BlockSpec(memory_space=pltpu.MemorySpace.VMEM),   # w_slab [R,3E+2,E]
            pl.BlockSpec(memory_space=pltpu.MemorySpace.VMEM),   # eval_slab [E+2,H]
            pl.BlockSpec(memory_space=pltpu.MemorySpace.VMEM),   # mask_col [M,1]
            pl.BlockSpec(memory_space=pltpu.MemorySpace.VMEM),   # pnt [M,3]
        ],
        out_specs=pl.BlockSpec(memory_space=pltpu.MemorySpace.SMEM),
    )(rule_ids, scal, vectors_init, ind_steps, pars_steps,
      w_slab, eval_slab, mask_col, pnt)
    return out[0, 0], out[0, 1], out[0, 2]


# ---------------------------------------------------------------------------
# Deterministic setup + run
# ---------------------------------------------------------------------------

if __name__ == "__main__":
    key = jax.random.PRNGKey(0)
    ks = list(jax.random.split(key, 16))

    n_thax = 8          # initial axiom embeddings
    n_nodes = 24        # len(ids)
    S, m = 2, 8

    # init_embeds: learned per-thax embeddings -> deterministic random rows here.
    vectors = jnp.zeros((n_nodes, EMBED), jnp.float32)
    vectors = vectors.at[:n_thax].set(
        0.1 * jax.random.normal(ks[0], (n_thax, EMBED), jnp.float32))

    # Two derivation steps (rule_steps = [52, 53]), each deriving 8 nodes from 2 parents.
    ind_steps = jnp.stack([jnp.arange(8, 16, dtype=jnp.int32),
                           jnp.arange(16, 24, dtype=jnp.int32)])          # [S, m]
    pars0 = jax.random.randint(ks[1], (m, 2), 0, 8).astype(jnp.int32)
    pars1 = jax.random.randint(ks[2], (m, 2), 0, 16).astype(jnp.int32)

    # Kernel layouts: ind as [S,1,m] row per step; pars as [S,2m,1] column per step
    # (first m entries = parent-0 rows, last m = parent-1 rows).
    ind_k = ind_steps.reshape(S, 1, m)
    pars_k = jnp.stack([
        jnp.concatenate([pars0[:, 0], pars0[:, 1]]),
        jnp.concatenate([pars1[:, 0], pars1[:, 1]]),
    ]).reshape(S, 2 * m, 1).astype(jnp.int32)

    # TODO(synk): exact deriv_mlps / eval_net architectures are external Modules in the
    # original; 2-layer ReLU MLPs are used as deterministic stand-ins.
    def make_deriv_params(k):
        k1, k2 = jax.random.split(k)
        w1 = 0.1 * jax.random.normal(k1, (2 * EMBED, EMBED), jnp.float32)
        b1 = jnp.zeros((1, EMBED), jnp.float32)
        w2 = 0.1 * jax.random.normal(k2, (EMBED, EMBED), jnp.float32)
        b2 = jnp.zeros((1, EMBED), jnp.float32)
        return w1, b1, w2, b2

    p52 = make_deriv_params(ks[3])
    p53 = make_deriv_params(ks[4])

    def pack_slab(p):  # rows: W1 (2E) | W2 (E) | b1 | b2  -> [3E+2, E]
        return jnp.concatenate([p[0], p[2], p[1], p[3]], axis=0)

    w_slab = jnp.stack([pack_slab(p52), pack_slab(p53)])          # [R, 3E+2, E]
    rule_ids = jnp.array([0, 1], dtype=jnp.int32)                 # rules 52,53 -> dense 0,1

    # eval_net: Linear(E, H) -> ReLU -> Linear(H, 1), packed as one slab [E+2, H].
    ew1 = 0.1 * jax.random.normal(ks[5], (EMBED, EVAL_HIDDEN), jnp.float32)
    eb1 = jnp.zeros((1, EVAL_HIDDEN), jnp.float32)
    ew2 = 0.1 * jax.random.normal(ks[6], (EVAL_HIDDEN, 1), jnp.float32)
    eb2 = jnp.zeros((1,), jnp.float32)
    eval_slab = jnp.concatenate([ew1, eb1, ew2.reshape(1, EVAL_HIDDEN)], axis=0)

    # mask selects the derived nodes; pos/neg/target per node.
    mask_idx = jnp.arange(8, 24, dtype=jnp.int32)
    M = mask_idx.shape[0]
    mask_col = mask_idx.reshape(M, 1)

    pos = jax.random.uniform(ks[7], (n_nodes,), jnp.float32)
    neg = jax.random.uniform(ks[8], (n_nodes,), jnp.float32)
    target = (jax.random.uniform(ks[9], (n_nodes,)) > 0.5).astype(jnp.float32)

    tot_pos = jnp.sum(pos)
    tot_neg = jnp.sum(neg)
    pos_weight = jnp.where(tot_pos > 0,
                           POS_WEIGHT_EXTRA * tot_neg / tot_pos,
                           1.0).astype(jnp.float32)

    pnt = jnp.stack([pos[mask_idx], neg[mask_idx], target[mask_idx]], axis=1)  # [M, 3]
    scal = jnp.concatenate([eb2.reshape(-1), pos_weight.reshape(-1)]).astype(jnp.float32)

    loss, posok, negok = learning_model_forward(
        vectors, rule_ids, ind_k, pars_k, w_slab, eval_slab, scal, mask_col, pnt)

    jax.block_until_ready((loss, posok, negok))
    print("KERNEL_OK")
</pallas_src>

<mosaic_0001>
module attributes {stable_mosaic.version = 11 : i64} {
  func.func @_fused_kernel(%arg0: memref<2xi32, #tpu.memory_space<smem>>, %arg1: memref<2xf32, #tpu.memory_space<smem>>, %arg2: memref<24x32xf32, #tpu.memory_space<vmem>>, %arg3: memref<2x1x8xi32, #tpu.memory_space<vmem>>, %arg4: memref<2x16x1xi32, #tpu.memory_space<vmem>>, %arg5: memref<2x98x32xf32, #tpu.memory_space<vmem>>, %arg6: memref<34x32xf32, #tpu.memory_space<vmem>>, %arg7: memref<16x1xi32, #tpu.memory_space<vmem>>, %arg8: memref<16x3xf32, #tpu.memory_space<vmem>>, %arg9: memref<1x3xf32, #tpu.memory_space<smem>>) attributes {dimension_semantics = [], scalar_prefetch = 0 : i64, scratch_operands = 0 : i64, tpu.core_type = #tpu.core_type<tc>} {
    %c0 = arith.constant 0 : index
    %c0_0 = arith.constant 0 : index
    %0 = vector.load %arg2[%c0, %c0_0] : memref<24x32xf32, #tpu.memory_space<vmem>>, vector<24x32xf32>
    %c0_i32 = arith.constant 0 : i32
    %c2_i32 = arith.constant 2 : i32
    %1 = arith.addi %c0_i32, %c2_i32 : i32
    %c1_i32 = arith.constant 1 : i32
    %2 = scf.for %arg10 = %c0_i32 to %1 step %c1_i32 iter_args(%arg11 = %0) -> (vector<24x32xf32>)  : i32 {
      %76 = arith.index_cast %arg10 : i32 to index
      %77 = memref.load %arg0[%76] : memref<2xi32, #tpu.memory_space<smem>>
      %78 = arith.index_cast %77 : i32 to index
      %c0_33 = arith.constant 0 : index
      %c0_34 = arith.constant 0 : index
      %79 = vector.load %arg5[%78, %c0_33, %c0_34] : memref<2x98x32xf32, #tpu.memory_space<vmem>>, vector<1x98x32xf32>
      %80 = vector.shape_cast %79 : vector<1x98x32xf32> to vector<98x32xf32>
      %81 = vector.extract_strided_slice %80 {offsets = [0, 0], sizes = [32, 32], strides = [1, 1]} : vector<98x32xf32> to vector<32x32xf32>
      %82 = vector.extract_strided_slice %80 {offsets = [32, 0], sizes = [32, 32], strides = [1, 1]} : vector<98x32xf32> to vector<32x32xf32>
      %83 = vector.extract_strided_slice %80 {offsets = [64, 0], sizes = [32, 32], strides = [1, 1]} : vector<98x32xf32> to vector<32x32xf32>
      %84 = vector.extract_strided_slice %80 {offsets = [96, 0], sizes = [1, 32], strides = [1, 1]} : vector<98x32xf32> to vector<1x32xf32>
      %85 = vector.extract_strided_slice %80 {offsets = [97, 0], sizes = [1, 32], strides = [1, 1]} : vector<98x32xf32> to vector<1x32xf32>
      %86 = arith.index_cast %arg10 : i32 to index
      %c0_35 = arith.constant 0 : index
      %c0_36 = arith.constant 0 : index
      %87 = vector.load %arg4[%86, %c0_35, %c0_36] : memref<2x16x1xi32, #tpu.memory_space<vmem>>, vector<1x16x1xi32>
      %88 = vector.shape_cast %87 : vector<1x16x1xi32> to vector<16x1xi32>
      %89 = arith.index_cast %arg10 : i32 to index
      %c0_37 = arith.constant 0 : index
      %c0_38 = arith.constant 0 : index
      %90 = vector.load %arg3[%89, %c0_37, %c0_38] : memref<2x1x8xi32, #tpu.memory_space<vmem>>, vector<1x1x8xi32>
      %91 = vector.shape_cast %90 : vector<1x1x8xi32> to vector<1x8xi32>
      %92 = tpu.iota {dimensions = array<i32: 1>} : vector<16x24xi32>
      %93 = vector.broadcast %88 : vector<16x1xi32> to vector<16x24xi32>
      %94 = arith.cmpi eq, %92, %93 : vector<16x24xi32>
      %95 = arith.extui %94 : vector<16x24xi1> to vector<16x24xi32>
      %96 = arith.sitofp %95 : vector<16x24xi32> to vector<16x24xf32>
      %cst_39 = arith.constant dense<0.000000e+00> : vector<16x32xf32>
      %97 = tpu.matmul %96, %arg11, %cst_39 {dimension_numbers = #tpu.dot_dimension_numbers<[1], [0], [0], [1], [0, 0, 1, 1], [], []>} : vector<16x24xf32>, vector<24x32xf32>, vector<16x32xf32> -> vector<16x32xf32>
      %98 = vector.extract_strided_slice %97 {offsets = [0, 0], sizes = [8, 32], strides = [1, 1]} : vector<16x32xf32> to vector<8x32xf32>
      %99 = vector.extract_strided_slice %97 {offsets = [8, 0], sizes = [8, 32], strides = [1, 1]} : vector<16x32xf32> to vector<8x32xf32>
      %cst_40 = arith.constant dense<0.000000e+00> : vector<8x32xf32>
      %100 = tpu.matmul %98, %81, %cst_40 {dimension_numbers = #tpu.dot_dimension_numbers<[1], [0], [0], [1], [0, 0, 1, 1], [], []>} : vector<8x32xf32>, vector<32x32xf32>, vector<8x32xf32> -> vector<8x32xf32>
      %cst_41 = arith.constant dense<0.000000e+00> : vector<8x32xf32>
      %101 = tpu.matmul %99, %82, %cst_41 {dimension_numbers = #tpu.dot_dimension_numbers<[1], [0], [0], [1], [0, 0, 1, 1], [], []>} : vector<8x32xf32>, vector<32x32xf32>, vector<8x32xf32> -> vector<8x32xf32>
      %102 = arith.addf %100, %101 : vector<8x32xf32>
      %103 = vector.broadcast %84 : vector<1x32xf32> to vector<8x32xf32>
      %104 = arith.addf %102, %103 : vector<8x32xf32>
      %cst_42 = arith.constant 0.000000e+00 : f32
      %105 = vector.broadcast %cst_42 : f32 to vector<8x32xf32>
      %106 = arith.maximumf %104, %105 : vector<8x32xf32>
      %cst_43 = arith.constant dense<0.000000e+00> : vector<8x32xf32>
      %107 = tpu.matmul %106, %83, %cst_43 {dimension_numbers = #tpu.dot_dimension_numbers<[1], [0], [0], [1], [0, 0, 1, 1], [], []>} : vector<8x32xf32>, vector<32x32xf32>, vector<8x32xf32> -> vector<8x32xf32>
      %108 = vector.broadcast %85 : vector<1x32xf32> to vector<8x32xf32>
      %109 = arith.addf %107, %108 : vector<8x32xf32>
      %110 = tpu.iota {dimensions = array<i32: 0>} : vector<24x8xi32>
      %111 = vector.broadcast %91 : vector<1x8xi32> to vector<24x8xi32>
      %112 = arith.cmpi eq, %110, %111 : vector<24x8xi32>
      %113 = arith.extui %112 : vector<24x8xi1> to vector<24x8xi32>
      %114 = arith.sitofp %113 : vector<24x8xi32> to vector<24x8xf32>
      %cst_44 = arith.constant dense<0.000000e+00> : vector<24x32xf32>
      %115 = tpu.matmul %114, %109, %cst_44 {dimension_numbers = #tpu.dot_dimension_numbers<[1], [0], [0], [1], [0, 0, 1, 1], [], []>} : vector<24x8xf32>, vector<8x32xf32>, vector<24x32xf32> -> vector<24x32xf32>
      %cst_45 = arith.constant dense<0.000000e+00> : vector<24xf32>
      %116 = vector.multi_reduction <add>, %114, %cst_45 [1] : vector<24x8xf32> to vector<24xf32>
      %117 = vector.shape_cast %116 : vector<24xf32> to vector<24x1xf32>
      %cst_46 = arith.constant 1.000000e+00 : f32
      %118 = vector.broadcast %cst_46 : f32 to vector<24x1xf32>
      %119 = arith.subf %118, %117 : vector<24x1xf32>
      %120 = vector.broadcast %119 : vector<24x1xf32> to vector<24x32xf32>
      %121 = arith.mulf %arg11, %120 : vector<24x32xf32>
      %122 = arith.addf %121, %115 : vector<24x32xf32>
      scf.yield %122 : vector<24x32xf32>
    }
    %c2_i32_1 = arith.constant 2 : i32
    %c0_2 = arith.constant 0 : index
    %c0_3 = arith.constant 0 : index
    %3 = vector.load %arg7[%c0_2, %c0_3] : memref<16x1xi32, #tpu.memory_space<vmem>>, vector<16x1xi32>
    %4 = tpu.iota {dimensions = array<i32: 1>} : vector<16x24xi32>
    %5 = vector.broadcast %3 : vector<16x1xi32> to vector<16x24xi32>
    %6 = arith.cmpi eq, %4, %5 : vector<16x24xi32>
    %7 = arith.extui %6 : vector<16x24xi1> to vector<16x24xi32>
    %8 = arith.sitofp %7 : vector<16x24xi32> to vector<16x24xf32>
    %cst = arith.constant dense<0.000000e+00> : vector<16x32xf32>
    %9 = tpu.matmul %8, %2, %cst {dimension_numbers = #tpu.dot_dimension_numbers<[1], [0], [0], [1], [0, 0, 1, 1], [], []>} : vector<16x24xf32>, vector<24x32xf32>, vector<16x32xf32> -> vector<16x32xf32>
    %c0_4 = arith.constant 0 : index
    %c0_5 = arith.constant 0 : index
    %10 = vector.load %arg6[%c0_4, %c0_5] : memref<34x32xf32, #tpu.memory_space<vmem>>, vector<32x32xf32>
    %c32 = arith.constant 32 : index
    %c0_6 = arith.constant 0 : index
    %11 = vector.load %arg6[%c32, %c0_6] : memref<34x32xf32, #tpu.memory_space<vmem>>, vector<1x32xf32>
    %c33 = arith.constant 33 : index
    %c0_7 = arith.constant 0 : index
    %12 = vector.load %arg6[%c33, %c0_7] : memref<34x32xf32, #tpu.memory_space<vmem>>, vector<1x32xf32>
    %c0_8 = arith.constant 0 : index
    %13 = memref.load %arg1[%c0_8] : memref<2xf32, #tpu.memory_space<smem>>
    %c1 = arith.constant 1 : index
    %14 = memref.load %arg1[%c1] : memref<2xf32, #tpu.memory_space<smem>>
    %cst_9 = arith.constant dense<0.000000e+00> : vector<16x32xf32>
    %15 = tpu.matmul %9, %10, %cst_9 {dimension_numbers = #tpu.dot_dimension_numbers<[1], [0], [0], [1], [0, 0, 1, 1], [], []>} : vector<16x32xf32>, vector<32x32xf32>, vector<16x32xf32> -> vector<16x32xf32>
    %16 = vector.broadcast %11 : vector<1x32xf32> to vector<16x32xf32>
    %17 = arith.addf %15, %16 : vector<16x32xf32>
    %cst_10 = arith.constant 0.000000e+00 : f32
    %18 = vector.broadcast %cst_10 : f32 to vector<16x32xf32>
    %19 = arith.maximumf %17, %18 : vector<16x32xf32>
    %20 = vector.broadcast %12 : vector<1x32xf32> to vector<16x32xf32>
    %21 = arith.mulf %19, %20 : vector<16x32xf32>
    %cst_11 = arith.constant dense<0.000000e+00> : vector<16xf32>
    %22 = vector.multi_reduction <add>, %21, %cst_11 [1] : vector<16x32xf32> to vector<16xf32>
    %23 = vector.shape_cast %22 : vector<16xf32> to vector<16x1xf32>
    %24 = vector.broadcast %13 : f32 to vector<16x1xf32>
    %25 = arith.addf %23, %24 : vector<16x1xf32>
    %c0_12 = arith.constant 0 : index
    %c0_13 = arith.constant 0 : index
    %26 = vector.load %arg8[%c0_12, %c0_13] : memref<16x3xf32, #tpu.memory_space<vmem>>, vector<16x1xf32>
    %c0_14 = arith.constant 0 : index
    %c1_15 = arith.constant 1 : index
    %27 = vector.load %arg8[%c0_14, %c1_15] : memref<16x3xf32, #tpu.memory_space<vmem>>, vector<16x1xf32>
    %c0_16 = arith.constant 0 : index
    %c2 = arith.constant 2 : index
    %28 = vector.load %arg8[%c0_16, %c2] : memref<16x3xf32, #tpu.memory_space<vmem>>, vector<16x1xf32>
    %cst_17 = arith.constant 0.000000e+00 : f32
    %29 = vector.broadcast %cst_17 : f32 to vector<16x1xf32>
    %30 = arith.cmpf oge, %25, %29 : vector<16x1xf32>
    %31 = arith.extui %30 : vector<16x1xi1> to vector<16x1xi32>
    %32 = arith.sitofp %31 : vector<16x1xi32> to vector<16x1xf32>
    %33 = arith.mulf %26, %32 : vector<16x1xf32>
    %34 = vector.shape_cast %33 : vector<16x1xf32> to vector<1x16x1xf32>
    %cst_18 = arith.constant dense<0.000000e+00> : vector<1xf32>
    %35 = vector.multi_reduction <add>, %34, %cst_18 [1, 2] : vector<1x16x1xf32> to vector<1xf32>
    %36 = vector.shape_cast %35 : vector<1xf32> to vector<1x1x1xf32>
    %37 = vector.extract %36[0, 0, 0] : f32 from vector<1x1x1xf32>
    %cst_19 = arith.constant 0.000000e+00 : f32
    %38 = vector.broadcast %cst_19 : f32 to vector<16x1xf32>
    %39 = arith.cmpf olt, %25, %38 : vector<16x1xf32>
    %40 = arith.extui %39 : vector<16x1xi1> to vector<16x1xi32>
    %41 = arith.sitofp %40 : vector<16x1xi32> to vector<16x1xf32>
    %42 = arith.mulf %27, %41 : vector<16x1xf32>
    %43 = vector.shape_cast %42 : vector<16x1xf32> to vector<1x16x1xf32>
    %cst_20 = arith.constant dense<0.000000e+00> : vector<1xf32>
    %44 = vector.multi_reduction <add>, %43, %cst_20 [1, 2] : vector<1x16x1xf32> to vector<1xf32>
    %45 = vector.shape_cast %44 : vector<1xf32> to vector<1x1x1xf32>
    %46 = vector.extract %45[0, 0, 0] : f32 from vector<1x1x1xf32>
    %cst_21 = arith.constant 0.000000e+00 : f32
    %47 = vector.broadcast %cst_21 : f32 to vector<16x1xf32>
    %48 = arith.subf %47, %25 : vector<16x1xf32>
    %cst_22 = arith.constant 0.000000e+00 : f32
    %49 = vector.broadcast %cst_22 : f32 to vector<16x1xf32>
    %50 = arith.maximumf %48, %49 : vector<16x1xf32>
    %51 = math.absf %25 : vector<16x1xf32>
    %cst_23 = arith.constant 0.000000e+00 : f32
    %52 = vector.broadcast %cst_23 : f32 to vector<16x1xf32>
    %53 = arith.subf %52, %51 : vector<16x1xf32>
    %54 = math.exp %53 : vector<16x1xf32>
    %55 = math.log1p %54 : vector<16x1xf32>
    %56 = arith.addf %50, %55 : vector<16x1xf32>
    %57 = vector.broadcast %14 : f32 to vector<16x1xf32>
    %58 = arith.mulf %57, %28 : vector<16x1xf32>
    %cst_24 = arith.constant 1.000000e+00 : f32
    %59 = vector.broadcast %cst_24 : f32 to vector<16x1xf32>
    %60 = arith.subf %59, %28 : vector<16x1xf32>
    %61 = arith.addf %58, %60 : vector<16x1xf32>
    %62 = arith.mulf %61, %56 : vector<16x1xf32>
    %cst_25 = arith.constant 1.000000e+00 : f32
    %63 = vector.broadcast %cst_25 : f32 to vector<16x1xf32>
    %64 = arith.subf %63, %28 : vector<16x1xf32>
    %65 = arith.mulf %64, %25 : vector<16x1xf32>
    %66 = arith.addf %62, %65 : vector<16x1xf32>
    %67 = arith.addf %26, %27 : vector<16x1xf32>
    %68 = arith.mulf %67, %66 : vector<16x1xf32>
    %69 = vector.shape_cast %68 : vector<16x1xf32> to vector<1x16x1xf32>
    %cst_26 = arith.constant dense<0.000000e+00> : vector<1xf32>
    %70 = vector.multi_reduction <add>, %69, %cst_26 [1, 2] : vector<1x16x1xf32> to vector<1xf32>
    %71 = vector.shape_cast %70 : vector<1xf32> to vector<1x1x1xf32>
    %72 = vector.extract %71[0, 0, 0] : f32 from vector<1x1x1xf32>
    %c0_27 = arith.constant 0 : index
    %c0_28 = arith.constant 0 : index
    %73 = memref.load %arg9[%c0_27, %c0_28] : memref<1x3xf32, #tpu.memory_space<smem>>
    memref.store %72, %arg9[%c0_27, %c0_28] : memref<1x3xf32, #tpu.memory_space<smem>>
    %c0_29 = arith.constant 0 : index
    %c1_30 = arith.constant 1 : index
    %74 = memref.load %arg9[%c0_29, %c1_30] : memref<1x3xf32, #tpu.memory_space<smem>>
    memref.store %37, %arg9[%c0_29, %c1_30] : memref<1x3xf32, #tpu.memory_space<smem>>
    %c0_31 = arith.constant 0 : index
    %c2_32 = arith.constant 2 : index
    %75 = memref.load %arg9[%c0_31, %c2_32] : memref<1x3xf32, #tpu.memory_space<smem>>
    memref.store %46, %arg9[%c0_31, %c2_32] : memref<1x3xf32, #tpu.memory_space<smem>>
    return
  }
}

</mosaic_0001>

<bundles_post_ra>
// kernel: tpu_custom_call.1
= control target key start
LH: loop header
LB: loop body
LE: loop exit
PB: predicated region body
PF: predicated region fallthrough
CT: control target
= control target key end

     0   :  { %14 = vsyncpa [#allocation4], 0  ;;  %s1456_s0 = inlined_call_operand.vmem [shape: s32[2], index: 0, kind: input, shape index: {}]   ;;  %s1457_s1 = inlined_call_operand.vmem [shape: f32[2], index: 1, kind: input, shape index: {}]   ;;  %s1458_s2 = inlined_call_operand.vmem [shape: f32[24,32], index: 2, kind: input, shape index: {}]   ;;  %s1459_s3 = inlined_call_operand.vmem [shape: s32[2,1,8], index: 3, kind: input, shape index: {}]   ;;  %s1460_s4 = inlined_call_operand.vmem [shape: s32[2,16,1], index: 4, kind: input, shape index: {}]   ;;  %s1461_s5 = inlined_call_operand.vmem [shape: f32[2,98,32], index: 5, kind: input, shape index: {}]   ;;  %s1462_s6 = inlined_call_operand.vmem [shape: f32[34,32], index: 6, kind: input, shape index: {}]   ;;  %s1463_s7 = inlined_call_operand.vmem [shape: s32[16,1], index: 7, kind: input, shape index: {}]   ;;  %s1464_s8 = inlined_call_operand.vmem [shape: f32[16,3], index: 8, kind: input, shape index: {}]   ;;  %s1465_s9 = inlined_call_operand.hbm [shape: f32[1,3], index: 9, kind: output, shape index: {}]  }
   0x1   :  { %15 = vsyncpa [#allocation6], 0 }
   0x2   :  { %16 = vsyncpa [#allocation3], 0  ;;  %s23_s11 = sshll.u32 %s1456_s0, 4  ;;  %s33_s14 = sshll.u32 %s1457_s1, 4  ;;  %s24_s11 = int_to_ptr.vmem [resolvable:$true] %s23_s11  ;;  %s34_s14 = int_to_ptr.vmem [resolvable:$true] %s33_s14 }
   0x3   :  { %s1114_s15 = scalar_lea.vmem %s24_s11, 16  ;;  %p1119_p1 = scmp.lt.s32.totalorder %s24_s11, %s24_s11 }
   0x4   :  { %p1115_p0 = scmp.ne.s32.totalorder %s24_s11, %s1114_s15  ;;  %p1120_p2 = scmp.lt.s32.totalorder %s1114_s15, %s1114_s15 }
   0x6   :  { %p1121_p3 = por %p1120_p2, %p1119_p1 }
   0x8   :  { %p1122_p4 = pnand %p1121_p3, %p1115_p0 }
   0xa   :  { %1125 = shalt.err (!%p1122_p4)
}
   0xb   :  { %s1184_s16 = smov [#allocation2]   ;;  %s1126_s17 = scalar_lea.vmem %s34_s14, 16 }
   0xc   :  { %26 = dma.vmem_to_smem %s24_s11, 16, %s1184_s16, [#allocation4]  }
   0xd   :  { %p1127_p5 = scmp.ne.s32.totalorder %s34_s14, %s1126_s17  ;;  %p1131_p6 = scmp.lt.s32.totalorder %s34_s14, %s34_s14 }
   0xe   :  { %p1132_p7 = scmp.lt.s32.totalorder %s1126_s17, %s1126_s17 }
  0x10   :  { %p1133_p8 = por %p1132_p7, %p1131_p6 }
  0x12   :  { %p1134_p9 = pnand %p1133_p8, %p1127_p5 }
  0x14   :  { %1137 = shalt.err (!%p1134_p9)
}
  0x15   :  { %s1185_s0 = smov [#allocation5]  }
  0x16   :  { %36 = dma.vmem_to_smem %s34_s14, 16, %s1185_s0, [#allocation6]  }
  0x17   :  { %1162 = dma.done.wait [#allocation4], 16  }
  0x18   :  { %1163 = vsyncadd [#allocation4], 4294967280 }
  0x19   :  { %1164 = dma.done.wait [#allocation6], 16  }
  0x1a   :  { %1165 = vsyncadd [#allocation6], 4294967280 }
  0x1b   :  { %57 = sfence }
  0x1c   :  { %v58_v0 = vld [vmem:[%s1458_s2] sm:$0xff]   ;;  %v59_v1 = vld [vmem:[%s1458_s2 + $0x8] sm:$0xff]   ;;  %v60_v2 = vld [vmem:[%s1458_s2 + $0x10] sm:$0xff]   ;;  %s1265_s23 = smov 0  }
  0x1d LB: > { %v1186_v3 = vmov 0   ;;  %s920_s2 = sshll.u32 %s1182_s23, 4  ;;  %983 = vmatprep.subr.mxu1 %v1170_v2  ;;  %v1187_v4 = vmov 0.0   ;;  %s70_s27 = sld [smem:[#allocation2 + %s1182_s23]]  ;;  %v92_v9 = vlaneseq  ;;  %vm106_vm0 = vcmask 195584   ;;  %s1182_s23 = sphi %s1265_s23, %s66_s23   ;;  %v1178_v0 = vphi %v58_v0, %v1468_v0   ;;  %v1174_v1 = vphi %v59_v1, %v1467_v1   ;;  %v1170_v2 = vphi %v60_v2, %v1466_v2  }
  0x1e   : > { %1104 = vset.pattern.permute.xlu0 %v1186_v3  ;;  %1003 = vmatprep.subr.mxu0 %v1187_v4  ;;  %s87_s26 = scalar_lea.vmem %s1460_s4, %s920_s2  ;;  %vm1188_vm3 = vmmov 0   ;;  %vm188_vm4 = vcmask 261120   ;;  %s90_s13 = scalar_lea.vmem %s1459_s3, %s1182_s23  ;;  %vm435_vm8 = vcmask 64512  }
  0x1f   : > { %984 = vmatpush3.msra.mxu1 %v1170_v2  ;;  %v88_v5 = vld [vmem:[%s87_s26] sm:$0xff]  ;;  %v89_v6 = vld [vmem:[%s87_s26 + $0x8] sm:$0xff]  ;;  %v1301_v10 = vand.u32 127, %v92_v9  ;;  %1011 = vmatprep.mubr.msk.f32.mxu0 %vm1188_vm3, %v1187_v4  ;;  %v336_v27 = vshrl.u32 %v92_v9, 7  ;;  %s66_s23 = sadd.s32 1, %s1182_s23  }
  0x20   : > { %985 = vmatprep.subr.mxu1 %v1174_v1  ;;  %95 = vperm.xlu0 %1104, %v88_v5   ;;  %v928_v38 = vld [vmem:[%s90_s13] ss:$0 sm:$0xff]  ;;  %p63_p10 = scmp.ge.s32.totalorder %s66_s23, 2  }
  0x21   : > { %986 = vmatpush3.msra.mxu1 %v1174_v1  ;;  %v337_v28 = vsub.s32 0, %v336_v27  ;;  %v420_v39 = vadd.s32 8, %v336_v27  ;;  %vm426_vm5 = vcmp.eq.s32.totalorder %v336_v27, %v928_v38  ;;  %v421_v40 = vadd.s32 16, %v336_v27  ;;  %s1191_s25 = smov (%p63_p10), 127   ;;  %s1193_s11 = smov (%p63_p10), [#allocation7]  }
  0x22   : > { %987 = vmatprep.subr.mxu1 %v1178_v0  ;;  %v929_v41 = vsel %vm426_vm5, 1.0, %v1187_v4  ;;  %v343_v47 = vsub.s32 1, %v336_v27  ;;  %v1189_v9 = vmov (%p63_p10), 0   ;;  %v943_v27 = vld [vmem:[%s1462_s6 + $0x21] ss:$0 sm:$0xff] (%p63_p10)  ;;  %vm762_vm14 = vcmask (%p63_p10), 7168  }
  0x23   : > { %988 = vmatpush3.msra.mxu1 %v1178_v0  ;;  %s71_s28 = smul.u32 104, %s70_s27  ;;  %vm427_vm6 = vcmp.eq.s32.totalorder %v420_v39, %v928_v38  ;;  %vm428_vm7 = vcmp.eq.s32.totalorder %v421_v40, %v928_v38  ;;  %v525_v43 = vsel %vm435_vm8, %v929_v41, 0.0 }
  0x24   : > { %992 = vmatprep.subr.mxu1 %v1187_v4  ;;  %98 = vperm.xlu0 %1104, %v89_v6   ;;  %v931_v42 = vsel %vm428_vm7, 1.0, %v1187_v4  ;;  %v930_v45 = vsel %vm427_vm6, 1.0, %v1187_v4 }
  0x25   : > { %s1295_s10 = scalar_lea.vmem %s1461_s5, %s71_s28  ;;  %v531_v44 = vsel %vm435_vm8, %v931_v42, 0.0  ;;  %526 = vadd.xlane.f32.xlu1 %v525_v43  ;;  %v528_v46 = vsel %vm435_vm8, %v930_v45, 0.0  ;;  %s1192_s28 = smov (%p63_p10), 126  }
  0x26   : > { %v76_v7 = vld [vmem:[%s1295_s10 + $0x18] sm:$0xff]  ;;  %v75_v8 = vld [vmem:[%s1295_s10 + $0x10] sm:$0xff]  ;;  %v78_v17 = vld [vmem:[%s1295_s10 + $0x28] sm:$0xff] }
  0x27   : > { %1004 = vmatpush3.msra.mxu0 %v76_v7  ;;  %v80_v14 = vld [vmem:[%s1295_s10 + $0x38] sm:$0xff]  ;;  %v79_v16 = vld [vmem:[%s1295_s10 + $0x30] sm:$0xff]  ;;  %v77_v18 = vld [vmem:[%s1295_s10 + $0x20] sm:$0xff] }
  0x28   : > { %1005 = vmatprep.subr.mxu0 %v1187_v4  ;;  %v74_v19 = vld [vmem:[%s1295_s10 + $0x8] sm:$0xff]  ;;  %v73_v20 = vld [vmem:[%s1295_s10] sm:$0xff]  ;;  %v84_v23 = vld [vmem:[%s1295_s10 + $0x58] sm:$0xff]  ;;  %1105 = vset.pattern.permute.xlu0 (%p63_p10), %v1189_v9 }
  0x29   : > { %1006 = vmatpush3.msra.mxu0 %v75_v8  ;;  %v83_v24 = vld [vmem:[%s1295_s10 + $0x50] sm:$0xff]  ;;  %v82_v25 = vld [vmem:[%s1295_s10 + $0x48] sm:$0xff]  ;;  %v81_v26 = vld [vmem:[%s1295_s10 + $0x40] sm:$0xff]  ;;  %529 = vadd.xlane.f32.xlu1 %v528_v46 }
  0x2a   : > { %1007 = vmatprep.subr.mxu0 %v1187_v4  ;;  %v85_v29 = vld [vmem:[%s1295_s10 + $0x60] sm:$0x3] }
  0x2b   : > { %1008 = vmatpush3.msra.mxu0 %v74_v19  ;;  %v338_v31 = vrot.slane %v85_v29, %v337_v28  ;;  %v344_v48 = vrot.slane %v85_v29, %v343_v47 }
  0x2c   : > { %1009 = vmatprep.subr.mxu0 %v1187_v4 }
  0x2d   : > { %1010 = vmatpush3.msra.mxu0 %v73_v20 }
  0x2e   : > { %1025 = vmatprep.subr.mxu0 %v1187_v4 }
  0x43   : > { %532 = vadd.xlane.f32.xlu0 %v531_v44 }
  0x9b   : > { %v96_v11 = vpop.permute.xlu0 %95 }
  0x9c   : > { %vm100_vm1 = vcmp.eq.s32.totalorder %v1301_v10, %v96_v11  ;;  %v544_v11 = vld [vmem:[%s1463_s7 + $0x8] sm:$0xff] (%p63_p10) }
  0x9d   : > { %v921_v12 = vsel %vm100_vm1, 1.0, %v1187_v4 }
  0x9e   : > { %989 = vmatprep.mubr.msk.f32.mxu1 %vm106_vm0, %v921_v12  ;;  %v644_v12 = vld [vmem:[%s1462_s6 + $0x18] sm:$0xff] (%p63_p10) }
  0x9f   : > { %v99_v13 = vpop.permute.xlu0 %98 }
  0xa0   : > { %vm101_vm2 = vcmp.eq.s32.totalorder %v1301_v10, %v99_v13  ;;  %v1190_v13 = vmov (%p63_p10), 0.0  }
  0xa1   : > { %v922_v15 = vsel %vm101_vm2, 1.0, %v1187_v4 }
  0xa2   : > { %990 = vmatmul.mubr.msk.f32.vlgmr.msra.gmra.mxu1 %vm106_vm0, %v922_v15 }
  0xa3   : > { %993 = vmatpush3.msra.mxu1 %v80_v14  ;;  %1000 = vmatprep.mubr.msk.f32.mxu1 %vm1188_vm3, %v1187_v4 }
  0xa4   : > { %994 = vmatprep.subr.mxu1 %v1187_v4 }
  0xa5   : > { %995 = vmatpush3.msra.mxu1 %v79_v16 }
  0xa6   : > { %996 = vmatprep.subr.mxu1 %v1187_v4 }
  0xa7   : > { %997 = vmatpush3.msra.mxu1 %v78_v17  ;;  %v642_v17 = vld [vmem:[%s1462_s6 + $0x8] sm:$0xff] (%p63_p10) }
  0xa8   : > { %998 = vmatprep.subr.mxu1 %v1187_v4 }
  0xa9   : > { %999 = vmatpush3.msra.mxu1 %v77_v18  ;;  %v641_v18 = vld [vmem:[%s1462_s6] sm:$0xff] (%p63_p10) }
  0xaa   : > { %1014 = vmatprep.subr.mxu1 %v1187_v4 }
  0xae   : > { %v527_v52 = vpop.xlane.xlu1 %526 }
  0xaf   : > { %v534_v53 = vsub.f32 1.0, %v527_v52 }
  0xb1   : > { %v537_v55 = vmul.f32 %v1178_v0, %v534_v53 }
  0xb2   : > { %v530_v54 = vpop.xlane.xlu1 %529 }
  0xb3   : > { %v535_v56 = vsub.f32 1.0, %v530_v54 }
  0xb5   : > { %v538_v60 = vmul.f32 %v1174_v1, %v535_v56 }
  0xcc   : > { %v533_v57 = vpop.xlane.xlu0 %532 }
  0xcd   : > { %v536_v61 = vsub.f32 1.0, %v533_v57 }
  0xcf   : > { %v539_v5 = vmul.f32 %v1170_v2, %v536_v61 }
 0x162   : > { %v991_v21 = vpop.f32.mrf.mxu1 }
 0x163   : > { %1001 = vmatmul.mubr.msk.f32.vlgmr.msra.gmra.mxu1 %vm188_vm4, %v991_v21 }
 0x164   : > { %v179_v22 = vpop.f32.mrf.mxu1  ;;  %1022 = vmatprep.mubr.msk.f32.mxu1 %vm1188_vm3, %v1187_v4  ;;  %1015 = vmatpush3.msra.mxu1 %v84_v23 }
 0x165   : > { %1012 = vmatmul.mubr.msk.f32.vlgmr.msra.gmra.mxu0 %vm188_vm4, %v179_v22  ;;  %1016 = vmatprep.subr.mxu1 %v1187_v4 }
 0x166   : > { %1027 = vmatprep.mubr.msk.f32.mxu0 %vm1188_vm3, %v1187_v4  ;;  %1017 = vmatpush3.msra.mxu1 %v83_v24 }
 0x167   : > { %1018 = vmatprep.subr.mxu1 %v1187_v4 }
 0x168   : > { %1019 = vmatpush3.msra.mxu1 %v82_v25 }
 0x169   : > { %1020 = vmatprep.subr.mxu1 %v1187_v4 }
 0x16a   : > { %1021 = vmatpush3.msra.mxu1 %v81_v26 }
 0x16b   :  { %1045 = vmatprep.subr.mxu1 (%p63_p10), %v644_v12 }
 0x223   : > { %v258_v30 = vpop.f32.mrf.mxu1 }
 0x225   : > { %v1002_v32 = vpop.f32.mrf.mxu1  ;;  %v331_v33 = vpop.f32.mrf.mxu0 }
 0x226   : > { %v332_v34 = vadd.f32 %v331_v33, %v258_v30  ;;  %v1406_v32 = vld [vmem:[%s1464_s8] sm:$0xff] (%p63_p10)  ;;  %v1413_v33 = vld [vmem:[%s1464_s8 + $0x8] sm:$0xff] (%p63_p10)  ;;  %s939_s8 = sld [smem:[#allocation5 + $0x1]] (%p63_p10) }
 0x227   : > { %v1013_v35 = vpop.f32.mrf.mxu0 }
 0x228   : > { %v339_v36 = vadd.f32 %v338_v31, %v332_v34 }
 0x22a   : > { %v340_v37 = vmax.f32 %v339_v36, 0.0 }
 0x22c   : > { %1023 = vmatmul.mubr.msk.f32.vlgmr.msra.gmra.mxu1 %vm188_vm4, %v340_v37 }
 0x22d   :  { %1046 = vmatpush3.msra.mxu1 (%p63_p10), %v644_v12 }
 0x2ec   : > { %v414_v49 = vpop.f32.mrf.mxu1 }
 0x2ed   : > { %v415_v50 = vadd.f32 %v414_v49, %v344_v48 }
 0x2ee   : > { %v1024_v51 = vpop.f32.mrf.mxu1 }
 0x2ef   : > { %1026 = vmatpush3.msra.mxu0 %v415_v50 }
 0x2f0   : > { %1028 = vmatmul.mubr.msk.f32.vlgmr.msra.gmra.mxu0 %vm435_vm8, %v929_v41 }
 0x2f1   : > { %1030 = vmatprep.mubr.msk.f32.mxu0 %vm1188_vm3, %v1187_v4 }
 0x2f4   : > { %1031 = vmatmul.mubr.msk.f32.gmra.mxu0 %vm435_vm8, %v930_v45 }
 0x2f5   : > { %1033 = vmatprep.mubr.msk.f32.mxu0 %vm1188_vm3, %v1187_v4 }
 0x2f8   : > { %1034 = vmatmul.mubr.msk.f32.gmra.mxu0 %vm435_vm8, %v931_v42 }
 0x3b0   : > { %v511_v58 = vpop.f32.mrf.mxu0 }
 0x3b1   : > { %v540_v59 = vadd.f32 %v537_v55, %v511_v58  }
 0x3b2   : > { %v1029_v62 = vpop.f32.mrf.mxu0 }
 0x3b3   : > { %v1468_v0 = vmov %v540_v59 }
 0x3b4   : > { %v516_v63 = vpop.f32.mrf.mxu0  ;;  %v543_v0 = vld [vmem:[%s1463_s7] sm:$0xff] (%p63_p10) }
 0x3b5   : > { %v541_v3 = vadd.f32 %v538_v60, %v516_v63   ;;  %548 = vperm.xlu0 (%p63_p10), %1105, %v543_v0  }
 0x3b6   : > { %v1032_v4 = vpop.f32.mrf.mxu0 }
 0x3b7   : > { %v1467_v1 = vmov %v541_v3  ;;  %65 = sbr.rel (!%p63_p10) target bundleno = 29 (0x1d), region = 77 }
 0x3b8   : > { %v521_v6 = vpop.f32.mrf.mxu0  ;;  %v643_v1 = vld [vmem:[%s1462_s6 + $0x10] sm:$0xff] (%p63_p10) }
 0x3b9   : > { %v542_v7 = vadd.f32 %v539_v5, %v521_v6   ;;  %551 = vperm.xlu0 (%p63_p10), %1105, %v544_v11   ;;  %1047 = vmatprep.subr.mxu1 (%p63_p10), %v643_v1  ;;  %v839_v11 = vsub.f32 (%p63_p10), 1.0, %v1413_v33 }
 0x3ba   : > { %v1035_v8 = vpop.f32.mrf.mxu0  ;;  %1048 = vmatpush3.msra.mxu1 (%p63_p10), %v643_v1 }
 0x3bb   : > { %v1466_v2 = vmov %v542_v7  ;;  %1036 = vmatprep.subr.mxu0 (%p63_p10), %v542_v7  ;;  %1049 = vmatprep.subr.mxu1 (%p63_p10), %v642_v17 }
 0x3bc   :  { %1037 = vmatpush3.msra.mxu0 %v542_v7  ;;  %1050 = vmatpush3.msra.mxu1 %v642_v17 }
 0x3bd   :  { %1038 = vmatprep.subr.mxu0 %v541_v3  ;;  %1051 = vmatprep.subr.mxu1 %v641_v18 }
 0x3be   :  { %1039 = vmatpush3.msra.mxu0 %v541_v3  ;;  %1052 = vmatpush3.msra.mxu1 %v641_v18  ;;  %v835_v3 = vstv %s939_s8 }
 0x3bf   :  { %1040 = vmatprep.subr.mxu0 %v540_v59  ;;  %850 = vrot.lane.b32.xlu0 %v1406_v32, %s1191_s25  ;;  %v837_v7 = vmul.f32 %v835_v3, %v1413_v33  ;;  %v836_v12 = vmul.f32 %v835_v3, %v1406_v32 }
 0x3c0   :  { %1041 = vmatpush3.msra.mxu0 %v540_v59 }
 0x3c1   :  { %v841_v17 = vadd.f32 %v839_v11, %v837_v7 }
 0x430   :  { %v549_v2 = vpop.permute.xlu0 %548 }
 0x431   :  { %vm553_vm9 = vcmp.eq.s32.totalorder %v1301_v10, %v549_v2 }
 0x432   :  { %v935_v14 = vsel %vm553_vm9, 1.0, %v1190_v13 }
 0x433   :  { %1042 = vmatprep.mubr.msk.f32.mxu0 %vm106_vm0, %v935_v14 }
 0x434   :  { %v552_v15 = vpop.permute.xlu0 %551 }
 0x435   :  { %vm554_vm10 = vcmp.eq.s32.totalorder %v1301_v10, %v552_v15  ;;  %v940_v10 = vld [vmem:[%s1462_s6 + $0x20] ss:$0 sm:$0xff]  ;;  %s647_s6 = sld [smem:[#allocation5]]  ;;  %v838_v15 = vsub.f32 1.0, %v1406_v32 }
 0x436   :  { %v936_v16 = vsel %vm554_vm10, 1.0, %v1190_v13 }
 0x437   :  { %1043 = vmatmul.mubr.msk.f32.vlgmr.msra.gmra.mxu0 %vm106_vm0, %v936_v16 }
 0x43b   :  { %v749_v34 = vstv %s647_s6 }
 0x4f7   :  { %v1044_v19 = vpop.f32.mrf.mxu0 }
 0x4f9   :  { %v632_v20 = vpop.f32.mrf.mxu0 }
 0x4fa   :  { %1053 = vmatprep.mubr.msk.f32.mxu1 %vm188_vm4, %v632_v20 }
 0x4fb   :  { %1054 = vmatmul.mubr.msk.f32.vlgmr.msra.gmra.mxu1 %vm188_vm4, %v1044_v19 }
 0x5bb   :  { %v1055_v21 = vpop.f32.mrf.mxu1 }
 0x5bc   :  { %v732_v22 = vadd.f32 %v1055_v21, %v940_v10  ;;  %v840_v21 = vadd.f32 %v838_v15, %v836_v12 }
 0x5bd   :  { %v726_v23 = vpop.f32.mrf.mxu1 }
 0x5be   :  { %v727_v24 = vadd.f32 %v940_v10, %v726_v23  ;;  %v736_v25 = vmax.f32 %v732_v22, 0.0 }
 0x5c0   :  { %v735_v26 = vmax.f32 %v727_v24, 0.0  ;;  %v742_v30 = vmul.f32 %v943_v27, %v736_v25 }
 0x5c2   :  { %v741_v28 = vmul.f32 %v943_v27, %v735_v26  ;;  %v746_v31 = vsel %vm188_vm4, %v742_v30, 0.0 }
 0x5c4   :  { %v743_v29 = vsel %vm188_vm4, %v741_v28, 0.0 }
 0x5c5   :  { %744 = vadd.xlane.f32.xlu1 %v743_v29 }
 0x5c9   :  { %747 = vadd.xlane.f32.xlu1 %v746_v31 }
 0x5da   :  { %852 = vrot.lane.b32.xlu1 %v1413_v33, %s1191_s25 }
 0x64e   :  { %v745_v35 = vpop.xlane.xlu1 %744 }
 0x64f   :  { %v1417_v36 = vadd.f32 %v749_v34, %v745_v35 }
 0x651   :  { %v807_v37 = vand.u32 2147483647, %v1417_v36  ;;  %vm775_vm11 = vcmp.lt.f32.partialorder %v1417_v36, 0.0  ;;  %vm754_vm12 = vcmp.ge.f32.partialorder %v1417_v36, 0.0  ;;  %v803_v8 = vsub.f32 0.0, %v1417_v36 }
 0x652   :  { %v748_v38 = vpop.xlane.xlu1 %747  ;;  %v946_v39 = vsel %vm775_vm11, 1.0, %v1190_v13  ;;  %v944_v40 = vsel %vm754_vm12, 1.0, %v1190_v13  ;;  %v844_v26 = vmul.f32 %v838_v15, %v1417_v36 }
 0x653   :  { %v809_v41 = vsub.f32 0.0, %v807_v37  ;;  %v1424_v42 = vadd.f32 %v749_v34, %v748_v38  ;;  %v781_v43 = vmul.f32 %v946_v39, %v1406_v32  ;;  %v760_v46 = vmul.f32 %v944_v40, %v1406_v32  ;;  %v851_v37 = vpop.permute.xlu0 %850 }
 0x654   :  { %v805_v18 = vmax.f32 %v803_v8, 0.0 }
 0x655   :  { %v811_v44 = vmul.f32 1.442695, %v809_v41  ;;  %v808_v45 = vand.u32 2147483647, %v1424_v42  ;;  %785 = vrot.lane.b32.xlu0 %v781_v43, %s1191_s25  ;;  %vm755_vm13 = vcmp.ge.f32.partialorder %v1424_v42, 0.0  ;;  %v763_v51 = vsel %vm762_vm14, %v760_v46, 0.0 }
 0x656   :  { %v945_v47 = vsel %vm755_vm13, 1.0, %v1190_v13  ;;  %v804_v4 = vsub.f32 0.0, %v1424_v42  ;;  %v845_v23 = vmul.f32 %v839_v11, %v1424_v42  ;;  %vm776_vm1 = vcmp.lt.f32.partialorder %v1424_v42, 0.0  ;;  %v853_v30 = vpop.permute.xlu1 %852 }
 0x657   :  { %1106 = vpow2.f32 %v811_v44  ;;  %v810_v48 = vsub.f32 0.0, %v808_v45  ;;  %v761_v49 = vmul.f32 %v945_v47, %v1413_v33  ;;  %v947_v28 = vsel %vm776_vm1, 1.0, %v1190_v13 }
 0x658   :  { %v806_v16 = vmax.f32 %v804_v4, 0.0  ;;  %v782_v29 = vmul.f32 %v947_v28, %v1413_v33  ;;  %v856_v13 = vadd.f32 %v851_v37, %v1406_v32  ;;  %v857_v44 = vadd.f32 %v853_v30, %v1413_v33 }
 0x659   :  { %v813_v50 = vmul.f32 1.442695, %v810_v48  ;;  %v764_v52 = vsel %vm762_vm14, %v761_v49, 0.0 }
 0x65a   :  { %v765_v53 = vadd.f32 %v764_v52, %v763_v51 }
 0x65b   :  { %1108 = vpow2.f32 %v813_v50 }
 0x65c   :  { %766 = vadd.xlane.f32.xlu1 %v765_v53 }
 0x664   :  { %v1107_v54 = vpop.eup %1106 }
 0x665   :  { %v815_v55 = vadd.f32 1.0, %v1107_v54  ;;  %v818_v58 = vmul.f32 -0.5, %v1107_v54  ;;  %v821_v62 = vand.u32 2147483647, %v1107_v54 }
 0x667   :  { %1110 = vlog2.f32 %v815_v55  ;;  %v819_v60 = vadd.f32 1.0, %v818_v58  ;;  %vm822_vm15 = vcmp.lt.f32.partialorder %v821_v62, 0.0004427343 }
 0x668   :  { %v1109_v56 = vpop.eup %1108 }
 0x669   :  { %v824_v57 = vadd.f32 1.0, %v1109_v56  ;;  %v827_v59 = vmul.f32 -0.5, %v1109_v56  ;;  %v830_v6 = vand.u32 2147483647, %v1109_v56  ;;  %v820_v0 = vmul.f32 %v1107_v54, %v819_v60 }
 0x66b   :  { %1112 = vlog2.f32 %v824_v57  ;;  %v828_v63 = vadd.f32 1.0, %v827_v59  ;;  %vm831_vm0 = vcmp.lt.f32.partialorder %v830_v6, 0.0004427343 }
 0x66d   :  { %v829_v2 = vmul.f32 %v1109_v56, %v828_v63 }
 0x674   :  { %v1111_v61 = vpop.eup %1110 }
 0x675   :  { %v817_v5 = vmul.f32 0.6931472, %v1111_v61 }
 0x677   :  { %v823_v14 = vsel %vm822_vm15, %v820_v0, %v817_v5 }
 0x678   :  { %v1113_v9 = vpop.eup %1112  ;;  %v833_v10 = vadd.f32 %v823_v14, %v805_v18 }
 0x679   :  { %v826_v1 = vmul.f32 0.6931472, %v1113_v9 }
 0x67a   :  { %v842_v25 = vmul.f32 %v840_v21, %v833_v10 }
 0x67b   :  { %v832_v19 = vsel %vm831_vm0, %v829_v2, %v826_v1 }
 0x67c   :  { %v834_v20 = vadd.f32 %v832_v19, %v806_v16  ;;  %v846_v27 = vadd.f32 %v844_v26, %v842_v25 }
 0x67e   :  { %v843_v22 = vmul.f32 %v841_v17, %v834_v20 }
 0x680   :  { %v847_v24 = vadd.f32 %v845_v23, %v843_v22 }
 0x682   :  { %862 = vrot.lane.b32.xlu0 %v847_v24, %s1192_s28 }
 0x686   :  { %860 = vrot.lane.b32.xlu0 %v846_v27, %s1192_s28 }
 0x68a   :  { %787 = vrot.lane.b32.xlu0 %v782_v29, %s1191_s25 }
 0x6c7   :  { %v786_v41 = vpop.permute.xlu0 %785 }
 0x6c8   :  { %v791_v47 = vsel %vm762_vm14, %v786_v41, 0.0 }
 0x6e5   :  { %v767_v31 = vpop.xlane.xlu1 %766 }
 0x6e6   :  { %v768_v34 = vrot.slane %v767_v31, 4 }
 0x6e8   :  { %v769_v35 = vadd.f32 %v768_v34, %v767_v31 }
 0x6ea   :  { %v770_v38 = vrot.slane %v769_v35, 2 }
 0x6ec   :  { %v771_v39 = vadd.f32 %v770_v38, %v769_v35 }
 0x6ee   :  { %v772_v40 = vrot.slane %v771_v39, 1 }
 0x6f0   :  { %v773_v36 = vadd.f32 %v772_v40, %v771_v39 }
 0x6f2   :  { %1056 = vpush %v773_v36 }
 0x6f4   :  { %v863_v42 = vpop.permute.xlu0 %862 }
 0x6f5   :  { %v867_v48 = vmul.f32 %v863_v42, %v857_v44 }
 0x6f7   :  { %v869_v52 = vsel %vm762_vm14, %v867_v48, 0.0 }
 0x6f8   :  { %v861_v43 = vpop.permute.xlu0 %860 }
 0x6f9   :  { %v866_v45 = vmul.f32 %v861_v43, %v856_v13 }
 0x6fb   :  { %v868_v51 = vsel %vm762_vm14, %v866_v45, 0.0 }
 0x6fc   :  { %v788_v46 = vpop.permute.xlu0 %787  ;;  %v870_v53 = vadd.f32 %v869_v52, %v868_v51 }
 0x6fd   :  { %v792_v49 = vsel %vm762_vm14, %v788_v46, 0.0 }
 0x6fe   :  { %v793_v50 = vadd.f32 %v792_v49, %v791_v47 }
 0x700   :  { %794 = vadd.xlane.f32.xlu0 %v793_v50 }
 0x704   :  { %871 = vadd.xlane.f32.xlu0 %v870_v53 }
 0x723   :  { %s1057_s29 = spop %1056 }
 0x724   :  { %883 = sst [smem:[#allocation7 + $0x1]] %s1057_s29 }
 0x789   :  { %v795_v32 = vpop.xlane.xlu0 %794 }
 0x78a   :  { %v796_v54 = vrot.slane %v795_v32, 4 }
 0x78c   :  { %v797_v33 = vadd.f32 %v796_v54, %v795_v32 }
 0x78d   :  { %v872_v55 = vpop.xlane.xlu0 %871 }
 0x78e   :  { %v798_v56 = vrot.slane %v797_v33, 2  ;;  %v873_v57 = vrot.slane %v872_v55, 4 }
 0x790   :  { %v874_v58 = vadd.f32 %v873_v57, %v872_v55  ;;  %v799_v59 = vadd.f32 %v798_v56, %v797_v33 }
 0x792   :  { %v875_v60 = vrot.slane %v874_v58, 2  ;;  %v800_v61 = vrot.slane %v799_v59, 1 }
 0x794   :  { %v876_v62 = vadd.f32 %v875_v60, %v874_v58  ;;  %v801_v63 = vadd.f32 %v800_v61, %v799_v59 }
 0x796   :  { %1058 = vpush %v801_v63  ;;  %v877_v3 = vrot.slane %v876_v62, 1 }
 0x798   :  { %v878_v5 = vadd.f32 %v877_v3, %v876_v62 }
 0x79a   :  { %1060 = vpush %v878_v5 }
 0x7c7   :  { %s1059_s30 = spop %1058 }
 0x7c8   :  { %885 = sst [smem:[#allocation7 + $0x2]] %s1059_s30 }
 0x7cb   :  { %s1061_s10 = spop %1060 }
 0x7cc   :  { %881 = sst [smem:[#allocation7]] %s1061_s10 }
 0x7cd   :  { %893 = dma.smem_to_hbm %s1193_s11, 16, %s1465_s9, [#allocation3]  }
 0x7ce   :  { %1166 = dma.done.wait [#allocation3], 16  }
 0x7cf   :  { %1167 = vsyncadd [#allocation3], 4294967280 }
 0x7d0   :  { %897 = sfence }
 0x7d1   :  { %898 = vsyncpa [#allocation3], 1 }
 0x7d2   :  { %899 = vsyncpa [#allocation4], 1 }
 0x7d3   :  { %900 = vsyncpa [#allocation6], 1 }

</bundles_post_ra>
